<compile_context>
chip_gen: v7x
topology: tpu7x:2x2x1
jax: 0.10.0
libtpu: 0.0.40
codegen_flags: <defaults>
</compile_context>

<pallas_src>
import functools

import jax
import jax.numpy as jnp
from jax import lax
from jax.experimental import pallas as pl
from jax.experimental.pallas import tpu as pltpu

LEAKY_SLOPE = 0.01   # nn.LeakyReLU() default negative_slope
BN_EPS = 1e-5        # nn.BatchNorm2d default eps


def _leaky_relu(x):
    return jnp.where(x >= 0, x, LEAKY_SLOPE * x)


# --------------------------------------------------------------------------
# Pallas kernel: one batch element per grid step, everything lane-dense.
# --------------------------------------------------------------------------
def _upsample_kernel(H, W, Cin, nu,
                     x_ref, t1_ref, b1_ref, t2_ref, b2_ref, r_ref, u_ref,
                     out_ref):
    H2 = H - 2
    x = x_ref[0].astype(jnp.float32)                       # (H, W*Cin)

    # Reflection pad (1 px) in the H direction only; the W-direction reflection
    # is folded into the conv1 lane-space weight matrix (t1_ref).
    xp = jnp.concatenate([x[1:2], x, x[H - 2:H - 1]], axis=0)        # (H+2, W*Cin)

    # conv1 + bn1 + bn2 (folded) as a single MXU matmul:
    # im2col over the 3 row taps -> (H, 3*W*Cin) @ (3*W*Cin, W*nu).
    x9 = jnp.concatenate([xp[0:H], xp[1:H + 1], xp[2:H + 2]], axis=1)
    y1 = jnp.dot(x9.astype(t1_ref.dtype), t1_ref[...],
                 preferred_element_type=jnp.float32) + b1_ref[...]
    y1 = _leaky_relu(y1)                                              # (H, W*nu)

    # conv2 + bn3 (folded), valid 3x3 conv -> (H2, W2*nu).
    y9 = jnp.concatenate([y1[0:H2], y1[1:H2 + 1], y1[2:H2 + 2]], axis=1)
    z = jnp.dot(y9.astype(t2_ref.dtype), t2_ref[...],
                preferred_element_type=jnp.float32) + b2_ref[...]
    z = _leaky_relu(z)                                                # (H2, W2*nu)

    # Bilinear 2x upsample (align_corners=False) as two MXU matmuls; the column
    # matrix U also performs the even/odd column interleave -> lane-dense output.
    zr = jnp.dot(r_ref[...], z, preferred_element_type=jnp.float32)   # (Ho, W2*nu)
    out = jnp.dot(zr, u_ref[...], preferred_element_type=jnp.float32)  # (Ho, Wo*nu)
    out_ref[0] = out.astype(out_ref.dtype)


# --------------------------------------------------------------------------
# Trace-time constant builders (pure JAX, run once per shape).
# --------------------------------------------------------------------------
def _conv_lane_matrix(w, w_in, w_out, src_col):
    """Lane-space (block-Toeplitz) conv matrices, one per row tap ky.

    w: (O, I, 3, 3) conv weights.
    src_col[kx]: (w_out,) input column read by tap kx of each output column
                 (W-direction padding/reflection is encoded here).
    Returns (KH, w_in*I, w_out*O); row index = wsrc*I + c, col index = wout*O + o.
    """
    O, I, KH, KW = w.shape
    wsrc = jnp.arange(w_in)[:, None]
    mats = []
    for ky in range(KH):
        m = jnp.zeros((w_in, I, w_out, O), w.dtype)
        for kx in range(KW):
            sel = (wsrc == src_col[kx][None, :]).astype(w.dtype)      # (w_in, w_out)
            m = m + sel[:, None, :, None] * w[:, :, ky, kx].T[None, :, None, :]
        mats.append(m.reshape(w_in * I, w_out * O))
    return jnp.stack(mats, axis=0)


def _upsample_matrix(n, dtype=jnp.float32):
    """(2n, n) interpolation matrix for 2x bilinear upsample, align_corners=False."""
    i = jnp.arange(2 * n)
    src = jnp.maximum((i + 0.5) / 2.0 - 0.5, 0.0)
    i0 = jnp.minimum(jnp.floor(src).astype(jnp.int32), n - 1)
    i1 = jnp.minimum(i0 + 1, n - 1)
    frac = (src - i0.astype(src.dtype)).astype(dtype)
    m = jnp.zeros((2 * n, n), dtype)
    m = m.at[i, i0].add(1.0 - frac)
    m = m.at[i, i1].add(frac)
    return m


# --------------------------------------------------------------------------
# Public wrapper: NCHW in, NCHW out (like the PyTorch module).
# --------------------------------------------------------------------------
def upsample_forward(x_nchw, p, *, matmul_dtype=jnp.float32):
    """Pallas implementation of UpSample.forward.  x_nchw: (N, Cin, H, W).

    matmul_dtype: dtype of the conv matmul operands.  jnp.bfloat16 is
    recommended on v6e/v7x at larger sizes (f32 accumulation is kept); f32 is
    the default so the tight numerical check below holds.
    """
    N, Cin, H, W = x_nchw.shape
    nu = p["w1"].shape[0]
    H2, W2 = H - 2, W - 2
    Ho, Wo = 2 * H2, 2 * W2

    # ---- fold bn1/bn2 into conv1 and bn3 into conv2 (inference affine) ----
    def bn_affine(g, b, m, v):
        s = g / jnp.sqrt(v + BN_EPS)
        return s, b - m * s

    s1, t1 = bn_affine(p["g1"], p["be1"], p["m1"], p["v1"])
    s2, t2 = bn_affine(p["g2"], p["be2"], p["m2"], p["v2"])
    s3, t3 = bn_affine(p["g3"], p["be3"], p["m3"], p["v3"])

    w1 = p["w1"] * s1[None, :, None, None]                           # bn1 scale
    b1 = p["b1"] + jnp.sum(p["w1"] * t1[None, :, None, None], axis=(1, 2, 3))
    w1 = w1 * s2[:, None, None, None]                                # bn2
    b1 = s2 * b1 + t2
    w2 = p["w2"] * s3[:, None, None, None]                           # bn3
    b2 = s3 * p["b2"] + t3

    # ---- lane-space conv matrices (W taps + reflect pad folded in) ----
    wout1 = jnp.arange(W)
    src1 = []
    for kx in range(3):
        j = jnp.abs(wout1 + kx - 1)                    # reflect pad=1, left edge
        j = jnp.where(j > W - 1, 2 * (W - 1) - j, j)   # reflect, right edge
        src1.append(j)
    t1m = _conv_lane_matrix(w1, W, W, src1).reshape(3 * W * Cin, W * nu)
    t1m = t1m.astype(matmul_dtype)

    wout2 = jnp.arange(W2)
    src2 = [wout2 + kx for kx in range(3)]             # valid conv, no pad
    t2m = _conv_lane_matrix(w2, W, W2, src2).reshape(3 * W * nu, W2 * nu)
    t2m = t2m.astype(matmul_dtype)

    b1f = jnp.tile(b1, W)[None, :]                     # (1, W*nu)
    b2f = jnp.tile(b2, W2)[None, :]                    # (1, W2*nu)

    # ---- bilinear 2x upsample as linear maps (does the interleave too) ----
    Rh = _upsample_matrix(H2)                                          # (Ho, H2)
    Uw = jnp.kron(_upsample_matrix(W2).T, jnp.eye(nu, dtype=jnp.float32))  # (W2*nu, Wo*nu)

    # NCHW -> (N, H, W*Cin): one transpose on the (small) input; reshape is free.
    x_flat = jnp.transpose(x_nchw, (0, 2, 3, 1)).reshape(N, H, W * Cin)

    kernel = functools.partial(_upsample_kernel, H, W, Cin, nu)

    def const_spec(arr):
        return pl.BlockSpec(arr.shape, lambda b, _n=arr.ndim: (0,) * _n)

    out_flat = pl.pallas_call(
        kernel,
        grid=(N,),
        in_specs=[
            pl.BlockSpec((1, H, W * Cin), lambda b: (b, 0, 0)),
            const_spec(t1m), const_spec(b1f),
            const_spec(t2m), const_spec(b2f),
            const_spec(Rh), const_spec(Uw),
        ],
        out_specs=pl.BlockSpec((1, Ho, Wo * nu), lambda b: (b, 0, 0)),
        out_shape=jax.ShapeDtypeStruct((N, Ho, Wo * nu), jnp.float32),
        compiler_params=pltpu.CompilerParams(dimension_semantics=("parallel",)),
    )(x_flat, t1m, b1f, t2m, b2f, Rh, Uw)

    # (N, Ho, Wo*nu) -> (N, Ho, Wo, nu) is a free reshape; one exit transpose.
    return jnp.transpose(out_flat.reshape(N, Ho, Wo, nu), (0, 3, 1, 2))


# --------------------------------------------------------------------------
# Parameters + pure-JAX reference (PyTorch semantics, inference-mode BN).
# --------------------------------------------------------------------------
def init_params(key, in_channels, nu, ku=3):
    ks = jax.random.split(key, 16)
    return {
        "w1": 0.2 * jax.random.normal(ks[0], (nu, in_channels, ku, ku), jnp.float32),
        "b1": 0.1 * jax.random.normal(ks[1], (nu,), jnp.float32),
        "w2": 0.2 * jax.random.normal(ks[2], (nu, nu, ku, ku), jnp.float32),
        "b2": 0.1 * jax.random.normal(ks[3], (nu,), jnp.float32),
        "g1": 1.0 + 0.1 * jax.random.normal(ks[4], (in_channels,), jnp.float32),
        "be1": 0.1 * jax.random.normal(ks[5], (in_channels,), jnp.float32),
        "m1": 0.1 * jax.random.normal(ks[6], (in_channels,), jnp.float32),
        "v1": jax.random.uniform(ks[7], (in_channels,), jnp.float32, 0.5, 1.5),
        "g2": 1.0 + 0.1 * jax.random.normal(ks[8], (nu,), jnp.float32),
        "be2": 0.1 * jax.random.normal(ks[9], (nu,), jnp.float32),
        "m2": 0.1 * jax.random.normal(ks[10], (nu,), jnp.float32),
        "v2": jax.random.uniform(ks[11], (nu,), jnp.float32, 0.5, 1.5),
        "g3": 1.0 + 0.1 * jax.random.normal(ks[12], (nu,), jnp.float32),
        "be3": 0.1 * jax.random.normal(ks[13], (nu,), jnp.float32),
        "m3": 0.1 * jax.random.normal(ks[14], (nu,), jnp.float32),
        "v3": jax.random.uniform(ks[15], (nu,), jnp.float32, 0.5, 1.5),
    }


def ref_forward(x, p):
    def bn(y, g, b, m, v):
        return (y - m[None, :, None, None]) / jnp.sqrt(v[None, :, None, None] + BN_EPS) \
               * g[None, :, None, None] + b[None, :, None, None]

    y = bn(x, p["g1"], p["be1"], p["m1"], p["v1"])
    y = jnp.pad(y, ((0, 0), (0, 0), (1, 1), (1, 1)), mode="reflect")
    y = lax.conv_general_dilated(y, p["w1"], (1, 1), "VALID",
                                 dimension_numbers=("NCHW", "OIHW", "NCHW"))
    y = y + p["b1"][None, :, None, None]
    y = _leaky_relu(bn(y, p["g2"], p["be2"], p["m2"], p["v2"]))
    y = lax.conv_general_dilated(y, p["w2"], (1, 1), "VALID",
                                 dimension_numbers=("NCHW", "OIHW", "NCHW"))
    y = y + p["b2"][None, :, None, None]
    y = _leaky_relu(bn(y, p["g3"], p["be3"], p["m3"], p["v3"]))

    def idx_w(n):
        i = jnp.arange(2 * n)
        src = jnp.maximum((i + 0.5) / 2.0 - 0.5, 0.0)
        i0 = jnp.minimum(jnp.floor(src).astype(jnp.int32), n - 1)
        i1 = jnp.minimum(i0 + 1, n - 1)
        return i0, i1, src - i0

    _, _, Hh, Ww = y.shape
    h0, h1, lh = idx_w(Hh)
    w0, w1_, lw = idx_w(Ww)
    y = y[:, :, h0, :] * (1 - lh)[None, None, :, None] + y[:, :, h1, :] * lh[None, None, :, None]
    y = y[:, :, :, w0] * (1 - lw)[None, None, None, :] + y[:, :, :, w1_] * lw[None, None, None, :]
    return y


if __name__ == "__main__":
    key = jax.random.PRNGKey(0)
    kx, kp = jax.random.split(key)
    N, Cin, H, W, nu = 2, 4, 16, 16, 8

    x = jax.random.normal(kx, (N, Cin, H, W), jnp.float32)
    params = init_params(kp, Cin, nu)

    out = jax.block_until_ready(upsample_forward(x, params))
    assert out.shape == (N, nu, 2 * (H - 2), 2 * (W - 2)), out.shape

    ref = jax.block_until_ready(ref_forward(x, params))
    err = float(jnp.max(jnp.abs(out - ref)))
    assert err < 2e-3, f"max abs error too large: {err}"

    print("KERNEL_OK")
</pallas_src>

<mosaic_0001>
module attributes {stable_mosaic.version = 11 : i64} {
  func.func @_upsample_kernel(%arg0: i32, %arg1: memref<1x16x64xf32, #tpu.memory_space<vmem>>, %arg2: memref<192x128xf32, #tpu.memory_space<vmem>>, %arg3: memref<1x128xf32, #tpu.memory_space<vmem>>, %arg4: memref<384x112xf32, #tpu.memory_space<vmem>>, %arg5: memref<1x112xf32, #tpu.memory_space<vmem>>, %arg6: memref<28x14xf32, #tpu.memory_space<vmem>>, %arg7: memref<112x224xf32, #tpu.memory_space<vmem>>, %arg8: memref<1x28x224xf32, #tpu.memory_space<vmem>>) attributes {dimension_semantics = [#tpu.dimension_semantics<parallel>], iteration_bounds = array<i64: 2>, scalar_prefetch = 0 : i64, scratch_operands = 0 : i64, tpu.core_type = #tpu.core_type<tc>, window_params = [{transform_indices = @transform_0, window_bounds = array<i64: 1, 16, 64>}, {pipeline_mode = #tpu.pipeline_mode<synchronous>, transform_indices = @transform_1, window_bounds = array<i64: 192, 128>}, {pipeline_mode = #tpu.pipeline_mode<synchronous>, transform_indices = @transform_2, window_bounds = array<i64: 1, 128>}, {pipeline_mode = #tpu.pipeline_mode<synchronous>, transform_indices = @transform_3, window_bounds = array<i64: 384, 112>}, {pipeline_mode = #tpu.pipeline_mode<synchronous>, transform_indices = @transform_4, window_bounds = array<i64: 1, 112>}, {pipeline_mode = #tpu.pipeline_mode<synchronous>, transform_indices = @transform_5, window_bounds = array<i64: 28, 14>}, {pipeline_mode = #tpu.pipeline_mode<synchronous>, transform_indices = @transform_6, window_bounds = array<i64: 112, 224>}, {transform_indices = @transform_7, window_bounds = array<i64: 1, 28, 224>}]} {
    %c0 = arith.constant 0 : index
    %c0_0 = arith.constant 0 : index
    %c0_1 = arith.constant 0 : index
    %0 = vector.load %arg1[%c0, %c0_0, %c0_1] : memref<1x16x64xf32, #tpu.memory_space<vmem>>, vector<1x16x64xf32>
    %1 = vector.shape_cast %0 : vector<1x16x64xf32> to vector<16x64xf32>
    %2 = vector.extract_strided_slice %1 {offsets = [1, 0], sizes = [1, 64], strides = [1, 1]} : vector<16x64xf32> to vector<1x64xf32>
    %3 = vector.extract_strided_slice %1 {offsets = [14, 0], sizes = [1, 64], strides = [1, 1]} : vector<16x64xf32> to vector<1x64xf32>
    %4 = tpu.concatenate %2, %1, %3 in 0 : vector<1x64xf32>, vector<16x64xf32>, vector<1x64xf32> -> vector<18x64xf32>
    %5 = vector.extract_strided_slice %4 {offsets = [0, 0], sizes = [16, 64], strides = [1, 1]} : vector<18x64xf32> to vector<16x64xf32>
    %6 = vector.extract_strided_slice %4 {offsets = [1, 0], sizes = [16, 64], strides = [1, 1]} : vector<18x64xf32> to vector<16x64xf32>
    %7 = vector.extract_strided_slice %4 {offsets = [2, 0], sizes = [16, 64], strides = [1, 1]} : vector<18x64xf32> to vector<16x64xf32>
    %8 = tpu.concatenate %5, %6, %7 in 1 : vector<16x64xf32>, vector<16x64xf32>, vector<16x64xf32> -> vector<16x192xf32>
    %c0_2 = arith.constant 0 : index
    %c0_3 = arith.constant 0 : index
    %9 = vector.load %arg2[%c0_2, %c0_3] : memref<192x128xf32, #tpu.memory_space<vmem>>, vector<192x128xf32>
    %cst = arith.constant dense<0.000000e+00> : vector<16x128xf32>
    %10 = tpu.matmul %8, %9, %cst {dimension_numbers = #tpu.dot_dimension_numbers<[1], [0], [0], [1], [0, 0, 1, 1], [], []>} : vector<16x192xf32>, vector<192x128xf32>, vector<16x128xf32> -> vector<16x128xf32>
    %c0_4 = arith.constant 0 : index
    %c0_5 = arith.constant 0 : index
    %11 = vector.load %arg3[%c0_4, %c0_5] : memref<1x128xf32, #tpu.memory_space<vmem>>, vector<1x128xf32>
    %12 = vector.broadcast %11 : vector<1x128xf32> to vector<16x128xf32>
    %13 = arith.addf %10, %12 : vector<16x128xf32>
    %cst_6 = arith.constant 0.000000e+00 : f32
    %14 = vector.broadcast %cst_6 : f32 to vector<16x128xf32>
    %15 = arith.cmpf oge, %13, %14 : vector<16x128xf32>
    %cst_7 = arith.constant 0.00999999977 : f32
    %16 = vector.broadcast %cst_7 : f32 to vector<16x128xf32>
    %17 = arith.mulf %16, %13 : vector<16x128xf32>
    %18 = arith.select %15, %13, %17 : vector<16x128xi1>, vector<16x128xf32>
    %19 = vector.extract_strided_slice %18 {offsets = [0, 0], sizes = [14, 128], strides = [1, 1]} : vector<16x128xf32> to vector<14x128xf32>
    %20 = vector.extract_strided_slice %18 {offsets = [1, 0], sizes = [14, 128], strides = [1, 1]} : vector<16x128xf32> to vector<14x128xf32>
    %21 = vector.extract_strided_slice %18 {offsets = [2, 0], sizes = [14, 128], strides = [1, 1]} : vector<16x128xf32> to vector<14x128xf32>
    %22 = tpu.concatenate %19, %20, %21 in 1 : vector<14x128xf32>, vector<14x128xf32>, vector<14x128xf32> -> vector<14x384xf32>
    %c0_8 = arith.constant 0 : index
    %c0_9 = arith.constant 0 : index
    %23 = vector.load %arg4[%c0_8, %c0_9] : memref<384x112xf32, #tpu.memory_space<vmem>>, vector<384x112xf32>
    %cst_10 = arith.constant dense<0.000000e+00> : vector<14x112xf32>
    %24 = tpu.matmul %22, %23, %cst_10 {dimension_numbers = #tpu.dot_dimension_numbers<[1], [0], [0], [1], [0, 0, 1, 1], [], []>} : vector<14x384xf32>, vector<384x112xf32>, vector<14x112xf32> -> vector<14x112xf32>
    %c0_11 = arith.constant 0 : index
    %c0_12 = arith.constant 0 : index
    %25 = vector.load %arg5[%c0_11, %c0_12] : memref<1x112xf32, #tpu.memory_space<vmem>>, vector<1x112xf32>
    %26 = vector.broadcast %25 : vector<1x112xf32> to vector<14x112xf32>
    %27 = arith.addf %24, %26 : vector<14x112xf32>
    %cst_13 = arith.constant 0.000000e+00 : f32
    %28 = vector.broadcast %cst_13 : f32 to vector<14x112xf32>
    %29 = arith.cmpf oge, %27, %28 : vector<14x112xf32>
    %cst_14 = arith.constant 0.00999999977 : f32
    %30 = vector.broadcast %cst_14 : f32 to vector<14x112xf32>
    %31 = arith.mulf %30, %27 : vector<14x112xf32>
    %32 = arith.select %29, %27, %31 : vector<14x112xi1>, vector<14x112xf32>
    %c0_15 = arith.constant 0 : index
    %c0_16 = arith.constant 0 : index
    %33 = vector.load %arg6[%c0_15, %c0_16] : memref<28x14xf32, #tpu.memory_space<vmem>>, vector<28x14xf32>
    %cst_17 = arith.constant dense<0.000000e+00> : vector<28x112xf32>
    %34 = tpu.matmul %33, %32, %cst_17 {dimension_numbers = #tpu.dot_dimension_numbers<[1], [0], [0], [1], [0, 0, 1, 1], [], []>} : vector<28x14xf32>, vector<14x112xf32>, vector<28x112xf32> -> vector<28x112xf32>
    %c0_18 = arith.constant 0 : index
    %c0_19 = arith.constant 0 : index
    %35 = vector.load %arg7[%c0_18, %c0_19] : memref<112x224xf32, #tpu.memory_space<vmem>>, vector<112x224xf32>
    %cst_20 = arith.constant dense<0.000000e+00> : vector<28x224xf32>
    %36 = tpu.matmul %34, %35, %cst_20 {dimension_numbers = #tpu.dot_dimension_numbers<[1], [0], [0], [1], [0, 0, 1, 1], [], []>} : vector<28x112xf32>, vector<112x224xf32>, vector<28x224xf32> -> vector<28x224xf32>
    %c0_21 = arith.constant 0 : index
    %c0_22 = arith.constant 0 : index
    %c0_23 = arith.constant 0 : index
    %37 = vector.load %arg8[%c0_21, %c0_22, %c0_23] : memref<1x28x224xf32, #tpu.memory_space<vmem>>, vector<1x28x224xf32>
    %38 = vector.shape_cast %37 : vector<1x28x224xf32> to vector<28x224xf32>
    %39 = vector.shape_cast %36 : vector<28x224xf32> to vector<1x28x224xf32>
    tpu.vector_store %arg8[%c0_21, %c0_22, %c0_23], %39 {strides = array<i32>} : memref<1x28x224xf32, #tpu.memory_space<vmem>>, vector<1x28x224xf32>,
    return
  }
  func.func @transform_0(%arg0: i32) -> (i32, i32, i32) {
    %c0_i32 = arith.constant 0 : i32
    %c0_i32_0 = arith.constant 0 : i32
    %c0_i32_1 = arith.constant 0 : i32
    return %arg0, %c0_i32, %c0_i32_0 : i32, i32, i32
  }
  func.func @transform_1(%arg0: i32) -> (i32, i32) {
    %c0_i32 = arith.constant 0 : i32
    %c0_i32_0 = arith.constant 0 : i32
    %c0_i32_1 = arith.constant 0 : i32
    return %c0_i32, %c0_i32_0 : i32, i32
  }
  func.func @transform_2(%arg0: i32) -> (i32, i32) {
    %c0_i32 = arith.constant 0 : i32
    %c0_i32_0 = arith.constant 0 : i32
    %c0_i32_1 = arith.constant 0 : i32
    return %c0_i32, %c0_i32_0 : i32, i32
  }
  func.func @transform_3(%arg0: i32) -> (i32, i32) {
    %c0_i32 = arith.constant 0 : i32
    %c0_i32_0 = arith.constant 0 : i32
    %c0_i32_1 = arith.constant 0 : i32
    return %c0_i32, %c0_i32_0 : i32, i32
  }
  func.func @transform_4(%arg0: i32) -> (i32, i32) {
    %c0_i32 = arith.constant 0 : i32
    %c0_i32_0 = arith.constant 0 : i32
    %c0_i32_1 = arith.constant 0 : i32
    return %c0_i32, %c0_i32_0 : i32, i32
  }
  func.func @transform_5(%arg0: i32) -> (i32, i32) {
    %c0_i32 = arith.constant 0 : i32
    %c0_i32_0 = arith.constant 0 : i32
    %c0_i32_1 = arith.constant 0 : i32
    return %c0_i32, %c0_i32_0 : i32, i32
  }
  func.func @transform_6(%arg0: i32) -> (i32, i32) {
    %c0_i32 = arith.constant 0 : i32
    %c0_i32_0 = arith.constant 0 : i32
    %c0_i32_1 = arith.constant 0 : i32
    return %c0_i32, %c0_i32_0 : i32, i32
  }
  func.func @transform_7(%arg0: i32) -> (i32, i32, i32) {
    %c0_i32 = arith.constant 0 : i32
    %c0_i32_0 = arith.constant 0 : i32
    %c0_i32_1 = arith.constant 0 : i32
    return %arg0, %c0_i32, %c0_i32_0 : i32, i32, i32
  }
}

</mosaic_0001>

<bundles_post_ra>
// kernel: tpu_custom_call.1
= control target key start
LH: loop header
LB: loop body
LE: loop exit
PB: predicated region body
PF: predicated region fallthrough
CT: control target
= control target key end

     0   :  { %s1289_s24 = smov 0   ;;  %s1668_s0 = inlined_call_operand.vmem [shape: f32[2,16,64], index: 0, kind: input, shape index: {}]   ;;  %s1669_s1 = inlined_call_operand.vmem [shape: f32[192,128], index: 1, kind: input, shape index: {}]   ;;  %s1670_s2 = inlined_call_operand.vmem [shape: f32[1,128], index: 2, kind: input, shape index: {}]   ;;  %s1671_s3 = inlined_call_operand.vmem [shape: f32[384,112], index: 3, kind: input, shape index: {}]   ;;  %s1672_s4 = inlined_call_operand.vmem [shape: f32[1,112], index: 4, kind: input, shape index: {}]   ;;  %s1673_s5 = inlined_call_operand.vmem [shape: f32[28,14], index: 5, kind: input, shape index: {}]   ;;  %s1674_s6 = inlined_call_operand.vmem [shape: f32[112,224], index: 6, kind: input, shape index: {}]   ;;  %s1675_s7 = inlined_call_operand.vmem [shape: f32[2,28,224], index: 7, kind: output, shape index: {}]  }
   0x1 LB: > { %s958_s25 = sadd.s32 4294967295, %s1243_s24   ;;  %p962_p0 = scmp.ge.s32.totalorder %s1243_s24, 1  ;;  %s1243_s24 = sphi %s1289_s24, %s17_s24  }
   0x2   : > { %p237_p1 = scmp.lt.s32.totalorder %s1243_s24, 3 }
   0x4   : > { %p238_p2 = pnand %p962_p0, %p237_p1 }
   0x5   : > { %p269_p3 = scmp.lt.s32.totalorder (!%p238_p2), %s958_s25, 1  ;;  %v319_v0 = vld [vmem:[%s1669_s1] sm:$0xff] (!%p238_p2)  ;;  %v1245_v1 = vmov (!%p238_p2), 0.0|0.0   ;;  %v320_v2 = vld [vmem:[%s1669_s1 + $0x8] sm:$0xff] (!%p238_p2)  ;;  %v321_v3 = vld [vmem:[%s1669_s1 + $0x10] sm:$0xff] (!%p238_p2)  ;;  %vm285_vm0 = vcmask (!%p238_p2), 1040384  }
   0x6   : > { %241 = sbr.rel (%p238_p2) target bundleno = 1059 (0x423), region = 48  ;;  %1091 = vmatprep.subr.bf16.mxu0 (!%p238_p2), %v1245_v1  ;;  %v322_v4 = vld [vmem:[%s1669_s1 + $0x18] sm:$0xff] (!%p238_p2)  ;;  %v1092_v5 = vpack.c.bf16 (!%p238_p2), %v320_v2, %v319_v0  ;;  %v323_v7 = vld [vmem:[%s1669_s1 + $0x20] sm:$0xff] (!%p238_p2)  ;;  %v324_v8 = vld [vmem:[%s1669_s1 + $0x28] sm:$0xff] (!%p238_p2)  ;;  %vm298_vm1 = vcmask (!%p238_p2), 1046528   ;;  %vm310_vm2 = vcmask (!%p238_p2), 1045504  }
   0x7   : > { %v1095_v6 = vpack.c.bf16 (!%p238_p2), %v322_v4, %v321_v3  ;;  %v1098_v15 = vpack.c.bf16 (!%p238_p2), %v324_v8, %v323_v7  ;;  %v325_v19 = vld [vmem:[%s1669_s1 + $0x30] sm:$0xff] (!%p238_p2)  ;;  %v326_v20 = vld [vmem:[%s1669_s1 + $0x38] sm:$0xff] (!%p238_p2)  ;;  %v463_v21 = vld [vmem:[%s1671_s3 + $0x80] sm:$0xff] (!%p238_p2)  ;;  %vm316_vm3 = vcmask (!%p238_p2), 523264   ;;  %s1246_s20 = smov (!%p238_p2), 64   ;;  %vm662_vm6 = vcmask (!%p238_p2), 113664  }
   0x8   : > { %1093 = vmatpush1.bf16.msra.mxu0 (!%p238_p2), %v1092_v5  ;;  %v464_v25 = vld [vmem:[%s1671_s3 + $0x88] sm:$0xff] (!%p238_p2)  ;;  %v447_v26 = vld [vmem:[%s1671_s3] sm:$0xff] (!%p238_p2)  ;;  %v465_v31 = vld [vmem:[%s1671_s3 + $0x90] sm:$0xff] (!%p238_p2)  ;;  %v1101_v34 = vpack.c.bf16 (!%p238_p2), %v326_v20, %v325_v19  ;;  %vm1247_vm9 = vmmov (!%p238_p2), 1   ;;  %vm791_vm11 = vcmask (!%p238_p2), 916480   ;;  %vm894_vm12 = vcmask (!%p238_p2), 785408  }
   0x9   : > { %1094 = vmatprep.subr.bf16.mxu0 (!%p238_p2), %v1245_v1  ;;  %v448_v27 = vld [vmem:[%s1671_s3 + $0x8] sm:$0xff] (!%p238_p2)  ;;  %v466_v32 = vld [vmem:[%s1671_s3 + $0x98] sm:$0xff] (!%p238_p2)  ;;  %v327_v35 = vld [vmem:[%s1669_s1 + $0x40] sm:$0xff] (!%p238_p2)  ;;  %v1127_v36 = vpack.c.bf16 (!%p238_p2), %v464_v25, %v463_v21  ;;  %vm901_vm13 = vcmask (!%p238_p2), 781312  }
   0xa   : > { %v1129_v37 = vpack.c.bf16 (!%p238_p2), %v448_v27, %v447_v26  ;;  %v449_v38 = vld [vmem:[%s1671_s3 + $0x10] sm:$0xff] (!%p238_p2)  ;;  %v450_v39 = vld [vmem:[%s1671_s3 + $0x18] sm:$0xff] (!%p238_p2)  ;;  %v328_v40 = vld [vmem:[%s1669_s1 + $0x48] sm:$0xff] (!%p238_p2)  ;;  %v1131_v43 = vpack.c.bf16 (!%p238_p2), %v466_v32, %v465_v31 }
   0xb   : > { %v467_v44 = vld [vmem:[%s1671_s3 + $0xa0] sm:$0xff] (!%p238_p2)  ;;  %v468_v45 = vld [vmem:[%s1671_s3 + $0xa8] sm:$0xff] (!%p238_p2)  ;;  %1128 = vmatprep.subr.bf16.mxu1 (!%p238_p2), %v1127_v36  ;;  %v1133_v47 = vpack.c.bf16 (!%p238_p2), %v450_v39, %v449_v38  ;;  %v1104_v48 = vpack.c.bf16 (!%p238_p2), %v328_v40, %v327_v35  ;;  %v329_v49 = vld [vmem:[%s1669_s1 + $0x50] sm:$0xff] (!%p238_p2) }
   0xc   : > { %1096 = vmatpush1.bf16.msra.mxu0 (!%p238_p2), %v1095_v6  ;;  %1130 = vmatpush3.bf16.msra.mxu1 (!%p238_p2), %v1129_v37  ;;  %v1135_v50 = vpack.c.bf16 (!%p238_p2), %v468_v45, %v467_v44  ;;  %v451_v51 = vld [vmem:[%s1671_s3 + $0x20] sm:$0xff] (!%p238_p2)  ;;  %v452_v52 = vld [vmem:[%s1671_s3 + $0x28] sm:$0xff] (!%p238_p2)  ;;  %v330_v53 = vld [vmem:[%s1669_s1 + $0x58] sm:$0xff] (!%p238_p2) }
   0xd   : > { %s1677_s25 = smov (!%p269_p3, %s958_s25), 1  ;;  %1097 = vmatprep.subr.bf16.mxu0 %v1245_v1  ;;  %1132 = vmatprep.subr.bf16.mxu1 %v1131_v43  ;;  %v469_v54 = vld [vmem:[%s1671_s3 + $0xb0] sm:$0xff]  ;;  %v470_v55 = vld [vmem:[%s1671_s3 + $0xb8] sm:$0xff]  ;;  %v1137_v56 = vpack.c.bf16 %v452_v52, %v451_v51  ;;  %v1107_v57 = vpack.c.bf16 %v330_v53, %v329_v49  ;;  %v331_v58 = vld [vmem:[%s1669_s1 + $0x60] sm:$0xff] }
   0xe   : > { %s982_s11 = sshll.u32 %s1677_s25, 4  ;;  %v1139_v59 = vpack.c.bf16 %v470_v55, %v469_v54  ;;  %v453_v60 = vld [vmem:[%s1671_s3 + $0x30] sm:$0xff]  ;;  %v454_v61 = vld [vmem:[%s1671_s3 + $0x38] sm:$0xff]  ;;  %v332_v62 = vld [vmem:[%s1669_s1 + $0x68] sm:$0xff]  ;;  %s983_s10 = sshll.u32 %s1677_s25, 6 }
   0xf   : > { %s273_s14 = scalar_lea.vmem %s1668_s0, %s982_s11  ;;  %v471_v63 = vld [vmem:[%s1671_s3 + $0xc0] sm:$0xff]  ;;  %v472_v0 = vld [vmem:[%s1671_s3 + $0xc8] sm:$0xff]  ;;  %v1141_v2 = vpack.c.bf16 %v454_v61, %v453_v60  ;;  %v1110_v3 = vpack.c.bf16 %v332_v62, %v331_v58  ;;  %v333_v7 = vld [vmem:[%s1669_s1 + $0x70] sm:$0xff]  ;;  %s278_s13 = scalar_lea.vmem %s1675_s7, %s983_s10 }
  0x10   : > { %v279_v9 = vld [vmem:[%s273_s14] sm:$0xff]  ;;  %v280_v10 = vld [vmem:[%s273_s14 + $0x8] sm:$0xff]  ;;  %1099 = vmatpush1.bf16.msra.mxu0 %v1098_v15  ;;  %1134 = vmatpush3.bf16.msra.mxu1 %v1133_v47  ;;  %v1143_v4 = vpack.c.bf16 %v472_v0, %v471_v63  ;;  %v334_v8 = vld [vmem:[%s1669_s1 + $0x78] sm:$0xff] }
  0x11   : > { %v282_v11 = vrot.slane %v279_v9, 1  ;;  %v286_v12 = vrot.slane %v279_v9, 7  ;;  %v287_v13 = vrot.slane %v280_v10, 7  ;;  %v292_v14 = vrot.slane %v280_v10, 5  ;;  %1100 = vmatprep.subr.bf16.mxu0 %v1245_v1  ;;  %1136 = vmatprep.subr.bf16.mxu1 %v1135_v50  ;;  %v455_v5 = vld [vmem:[%s1671_s3 + $0x40] sm:$0xff]  ;;  %v456_v6 = vld [vmem:[%s1671_s3 + $0x48] sm:$0xff]  ;;  %vm1192_vm10 = vmpackc.low %vm310_vm2, %vm1247_vm9 }
  0x12   : > { %v1145_v9 = vpack.c.bf16 %v456_v6, %v455_v5  ;;  %v1113_v10 = vpack.c.bf16 %v334_v8, %v333_v7  ;;  %v338_v15 = vld [vmem:[%s1669_s1 + $0x98] sm:$0xff]  ;;  %v339_v19 = vld [vmem:[%s1669_s1 + $0xa0] sm:$0xff]  ;;  %v340_v20 = vld [vmem:[%s1669_s1 + $0xa8] sm:$0xff] }
  0x13   : > { %v1323_v16 = vsel %vm285_vm0, %v286_v12, %v287_v13  ;;  %v1325_v17 = vsel %vm285_vm0, %v282_v11, %v286_v12  ;;  %v295_v18 = vsel %vm285_vm0, %v287_v13, %v292_v14  ;;  %v335_v11 = vld [vmem:[%s1669_s1 + $0x80] sm:$0xff]  ;;  %v336_v12 = vld [vmem:[%s1669_s1 + $0x88] sm:$0xff]  ;;  %v337_v14 = vld [vmem:[%s1669_s1 + $0x90] sm:$0xff]  ;;  %v1122_v21 = vpack.c.bf16 %v340_v20, %v339_v19 }
  0x14   : > { %v299_v22 = vrot.slane %v1325_v17, 1  ;;  %v300_v23 = vrot.slane %v1323_v16, 1  ;;  %v302_v24 = vrot.slane %v295_v18, 1  ;;  %v311_v28 = vrot.slane %v1325_v17, 2  ;;  %1102 = vmatpush1.bf16.msra.mxu0 %v1101_v34  ;;  %1138 = vmatpush3.bf16.msra.mxu1 %v1137_v56  ;;  %v458_v31 = vld [vmem:[%s1671_s3 + $0x58] sm:$0xff]  ;;  %v459_v35 = vld [vmem:[%s1671_s3 + $0x60] sm:$0xff] }
  0x15   : > { %v312_v29 = vrot.slane %v1323_v16, 2  ;;  %v314_v30 = vrot.slane %v295_v18, 2  ;;  %1103 = vmatprep.subr.bf16.mxu0 %v1245_v1  ;;  %1140 = vmatprep.subr.bf16.mxu1 %v1139_v59  ;;  %v1116_v13 = vpack.c.bf16 %v336_v12, %v335_v11  ;;  %v1119_v18 = vpack.c.bf16 %v338_v15, %v337_v14  ;;  %v460_v36 = vld [vmem:[%s1671_s3 + $0x68] sm:$0xff]  ;;  %v477_v38 = vld [vmem:[%s1671_s3 + $0xf0] sm:$0xff]  ;;  %v478_v39 = vld [vmem:[%s1671_s3 + $0xf8] sm:$0xff] }
  0x16   : > { %v301_v33 = vsel %vm298_vm1, %v299_v22, %v300_v23  ;;  %v303_v46 = vsel %vm298_vm1, %v300_v23, %v302_v24  ;;  %v341_v22 = vld [vmem:[%s1669_s1 + $0xb0] sm:$0xff]  ;;  %v342_v23 = vld [vmem:[%s1669_s1 + $0xb8] sm:$0xff]  ;;  %v1153_v37 = vpack.c.bf16 %v460_v36, %v459_v35  ;;  %v1155_v40 = vpack.c.bf16 %v478_v39, %v477_v38  ;;  %v479_v44 = vld [vmem:[%s1671_s3 + $0x100] sm:$0xff] }
  0x17   : > { %304 = vrot.lane.b32.xlu0 %v301_v33, %s1246_s20  ;;  %v313_v41 = vsel %vm310_vm2, %v311_v28, %v312_v29  ;;  %v1372_v42 = vsel %vm310_vm2, %v312_v29, %v314_v30  ;;  %v1125_v24 = vpack.c.bf16 %v342_v23, %v341_v22  ;;  %v473_v29 = vld [vmem:[%s1671_s3 + $0xd0] sm:$0xff]  ;;  %v476_v33 = vld [vmem:[%s1671_s3 + $0xe8] sm:$0xff]  ;;  %v967_v47 = vld [vmem:[%s1670_s2] ss:$0 sm:$0xff] }
  0x18   : > { %968 = vmatprep.mubr.msk.f32.mxu0 %vm316_vm3, %v313_v41  ;;  %1105 = vmatpush1.bf16.msra.mxu0 %v1104_v48  ;;  %v461_v41 = vld [vmem:[%s1671_s3 + $0x70] sm:$0xff]  ;;  %v480_v45 = vld [vmem:[%s1671_s3 + $0x108] sm:$0xff]  ;;  %v482_v59 = vld [vmem:[%s1671_s3 + $0x118] sm:$0xff] }
  0x19   : > { %1106 = vmatprep.subr.bf16.mxu0 %v1245_v1  ;;  %1142 = vmatpush3.bf16.msra.mxu1 %v1141_v2  ;;  %v481_v58 = vld [vmem:[%s1671_s3 + $0x110] sm:$0xff]  ;;  %v484_v5 = vld [vmem:[%s1671_s3 + $0x128] sm:$0xff]  ;;  %v486_v8 = vld [vmem:[%s1671_s3 + $0x138] sm:$0xff] }
  0x1a   : > { %1144 = vmatprep.subr.bf16.mxu1 %v1143_v4  ;;  %v1163_v2 = vpack.c.bf16 %v482_v59, %v481_v58  ;;  %v483_v4 = vld [vmem:[%s1671_s3 + $0x120] sm:$0xff]  ;;  %v485_v7 = vld [vmem:[%s1671_s3 + $0x130] sm:$0xff]  ;;  %v488_v11 = vld [vmem:[%s1671_s3 + $0x148] sm:$0xff] }
  0x1b   : > { %306 = vrot.lane.b32.xlu0 %v303_v46, %s1246_s20  ;;  %v1159_v46 = vpack.c.bf16 %v480_v45, %v479_v44  ;;  %v1167_v6 = vpack.c.bf16 %v484_v5, %v483_v4  ;;  %v490_v14 = vld [vmem:[%s1671_s3 + $0x158] sm:$0xff]  ;;  %v492_v19 = vld [vmem:[%s1671_s3 + $0x168] sm:$0xff]  ;;  %v773_v38 = vld [vmem:[%s1674_s6 + $0x50] sm:$0xff] }
  0x1c   : > { %1108 = vmatpush1.bf16.msra.mxu0 %v1107_v57  ;;  %v494_v22 = vld [vmem:[%s1671_s3 + $0x178] sm:$0xff]  ;;  %v776_v39 = vld [vmem:[%s1674_s6 + $0x68] sm:$0xff]  ;;  %v777_v44 = vld [vmem:[%s1674_s6 + $0x70] sm:$0xff] }
  0x1d   : > { %1109 = vmatprep.subr.bf16.mxu0 %v1245_v1  ;;  %1146 = vmatpush3.bf16.msra.mxu1 %v1145_v9  ;;  %v1171_v9 = vpack.c.bf16 %v486_v8, %v485_v7  ;;  %v780_v45 = vld [vmem:[%s1674_s6 + $0x88] sm:$0xff]  ;;  %v790_v58 = vld [vmem:[%s1674_s6 + $0xd8] sm:$0xff]  ;;  %v970_v7 = vld [vmem:[%s1672_s4] ss:$0 sm:$0xff] }
  0x20   : > { %1111 = vmatpush1.bf16.msra.mxu0 %v1110_v3 }
  0x21   : > { %1112 = vmatprep.subr.bf16.mxu0 %v1245_v1 }
  0x24   : > { %1114 = vmatpush1.bf16.msra.mxu0 %v1113_v10  ;;  %v487_v10 = vld [vmem:[%s1671_s3 + $0x140] sm:$0xff] }
  0x25   : > { %1115 = vmatprep.subr.bf16.mxu0 %v1245_v1  ;;  %v1175_v12 = vpack.c.bf16 %v488_v11, %v487_v10 }
  0x28   : > { %1117 = vmatpush1.bf16.msra.mxu0 %v1116_v13  ;;  %v489_v13 = vld [vmem:[%s1671_s3 + $0x150] sm:$0xff] }
  0x29   : > { %1118 = vmatprep.subr.bf16.mxu0 %v1245_v1  ;;  %v1179_v15 = vpack.c.bf16 %v490_v14, %v489_v13 }
  0x2c   : > { %1120 = vmatpush1.bf16.msra.mxu0 %v1119_v18  ;;  %v491_v18 = vld [vmem:[%s1671_s3 + $0x160] sm:$0xff] }
  0x2d   : > { %1121 = vmatprep.subr.bf16.mxu0 %v1245_v1  ;;  %v1183_v20 = vpack.c.bf16 %v492_v19, %v491_v18 }
  0x30   : > { %1123 = vmatpush1.bf16.msra.mxu0 %v1122_v21  ;;  %v493_v21 = vld [vmem:[%s1671_s3 + $0x170] sm:$0xff] }
  0x31   : > { %1124 = vmatprep.subr.bf16.mxu0 %v1245_v1  ;;  %v474_v1 = vld [vmem:[%s1671_s3 + $0xd8] sm:$0xff]  ;;  %v1187_v23 = vpack.c.bf16 %v494_v22, %v493_v21  ;;  %v659_v21 = vld [vmem:[%s1673_s5 + $0x8] sm:$0xff]  ;;  %v660_v22 = vld [vmem:[%s1673_s5 + $0x10] sm:$0xff] }
  0x32   : > { %v1147_v30 = vpack.c.bf16 %v474_v1, %v473_v29  ;;  %v765_v29 = vld [vmem:[%s1674_s6 + $0x10] sm:$0xff]  ;;  %v768_v1 = vld [vmem:[%s1674_s6 + $0x28] sm:$0xff] }
  0x34   : > { %1126 = vmatpush1.bf16.msra.mxu0 %v1125_v24  ;;  %1148 = vmatprep.subr.bf16.mxu1 %v1147_v30  ;;  %v658_v24 = vld [vmem:[%s1673_s5] sm:$0xff]  ;;  %v770_v30 = vld [vmem:[%s1674_s6 + $0x38] sm:$0xff] }
  0x89   : > { %v305_v25 = vpop.permute.xlu0 %304 }
  0x8a   : > { %v317_v26 = vsel %vm316_vm3, %v1325_v17, %v305_v25  ;;  %v457_v17 = vld [vmem:[%s1671_s3 + $0x50] sm:$0xff]  ;;  %v764_v25 = vld [vmem:[%s1674_s6 + $0x8] sm:$0xff] }
  0x8b   : > { %419 = vmatmul.mubr.f32.vlgmr.msra.gmra.mrb[0].mxu0 %v317_v26  ;;  %v1149_v32 = vpack.c.bf16 %v458_v31, %v457_v17  ;;  %v766_v26 = vld [vmem:[%s1674_s6 + $0x18] sm:$0xff]  ;;  %v1201_v31 = vpack.c.bf16 %v770_v30, %v768_v1 }
  0x8c   : > { %969 = vmatprep.mubr.msk.f32.mxu0 %vm316_vm3, %v1372_v42  ;;  %v462_v42 = vld [vmem:[%s1671_s3 + $0x78] sm:$0xff] }
  0x8d   : > { %v307_v27 = vpop.permute.xlu0 %306  ;;  %1150 = vmatpush3.bf16.msra.mxu1 %v1149_v32  ;;  %v1157_v43 = vpack.c.bf16 %v462_v42, %v461_v41  ;;  %v767_v32 = vld [vmem:[%s1674_s6 + $0x20] sm:$0xff] }
  0x8e   : > { %v318_v28 = vsel %vm316_vm3, %v1323_v16, %v307_v27  ;;  %v475_v16 = vld [vmem:[%s1671_s3 + $0xe0] sm:$0xff] }
  0x8f   : > { %424 = vmatmul.mubr.f32.gmra.mrb[2].mxu0 %v318_v28  ;;  %v1151_v34 = vpack.c.bf16 %v476_v33, %v475_v16  ;;  %v763_v27 = vld [vmem:[%s1674_s6] sm:$0xff]  ;;  %v1197_v28 = vpack.c.bf16 %v766_v26, %v764_v25  ;;  %v769_v16 = vld [vmem:[%s1674_s6 + $0x30] sm:$0xff]  ;;  %v772_v33 = vld [vmem:[%s1674_s6 + $0x48] sm:$0xff] }
  0x90   : > { %v1199_v17 = vpack.c.bf16 %v765_v29, %v763_v27  ;;  %v1203_v35 = vpack.c.bf16 %v769_v16, %v767_v32 }
  0x91   : > { %1152 = vmatprep.subr.bf16.mxu1 %v1151_v34  ;;  %1198 = vmatprep.subr.bf16.mxu0 %v1197_v28  ;;  %v774_v34 = vld [vmem:[%s1674_s6 + $0x58] sm:$0xff] }
  0x92   : > { %1154 = vmatpush3.bf16.msra.mxu1 %v1153_v37  ;;  %1200 = vmatpush1.bf16.msra.mxu0 %v1199_v17  ;;  %v1205_v36 = vpack.c.bf16 %v774_v34, %v772_v33  ;;  %v771_v37 = vld [vmem:[%s1674_s6 + $0x40] sm:$0xff] }
  0x93   : > { %1156 = vmatprep.subr.bf16.mxu1 %v1155_v40  ;;  %1202 = vmatprep.subr.bf16.mxu0 %v1201_v31  ;;  %v778_v40 = vld [vmem:[%s1674_s6 + $0x78] sm:$0xff]  ;;  %v1207_v41 = vpack.c.bf16 %v773_v38, %v771_v37 }
  0x94   : > { %v1209_v42 = vpack.c.bf16 %v778_v40, %v776_v39 }
  0x96   : > { %1158 = vmatpush3.bf16.msra.mxu1 %v1157_v43  ;;  %1204 = vmatpush1.bf16.msra.mxu0 %v1203_v35  ;;  %v775_v43 = vld [vmem:[%s1674_s6 + $0x60] sm:$0xff] }
  0x97   : > { %1160 = vmatprep.subr.bf16.mxu1 %v1159_v46  ;;  %1206 = vmatprep.subr.bf16.mxu0 %v1205_v36 }
  0x9a   : > { %1208 = vmatpush1.bf16.msra.mxu0 %v1207_v41 }
  0x9b   : > { %1210 = vmatprep.subr.bf16.mxu0 %v1209_v42 }
 0x15e   : > { %v420_v48 = vpop.f32.mrb[0].mxu0 }
 0x15f   : > { %v421_v49 = vadd.f32 %v967_v47, %v420_v48  ;;  %v422_v50 = vpop.f32.mrb[1].mxu0 }
 0x160   : > { %v781_v50 = vld [vmem:[%s1674_s6 + $0x90] sm:$0xff] }
 0x161   : > { %v431_v51 = vmul.f32 0.01, %v421_v49  ;;  %vm429_vm4 = vcmp.ge.f32.partialorder %v421_v49, 0.0 }
 0x162   : > { %v425_v52 = vpop.f32.mrb[2].mxu0 }
 0x163   : > { %v426_v53 = vadd.f32 %v967_v47, %v425_v52  ;;  %v427_v54 = vpop.f32.mrb[3].mxu0  ;;  %v433_v55 = vsel %vm429_vm4, %v421_v49, %v431_v51  ;;  %v1211_v47 = vpack.c.bf16 %v777_v44, %v775_v43  ;;  %v779_v49 = vld [vmem:[%s1674_s6 + $0x80] sm:$0xff]  ;;  %v784_v51 = vld [vmem:[%s1674_s6 + $0xa8] sm:$0xff]  ;;  %v786_v52 = vld [vmem:[%s1674_s6 + $0xb8] sm:$0xff] }
 0x164   : > { %v437_v60 = vrot.slane %v433_v55, 1  ;;  %v442_v62 = vrot.slane %v433_v55, 2  ;;  %v1217_v54 = vpack.c.bf16 %v786_v52, %v784_v51 }
 0x165   : > { %vm430_vm5 = vcmp.ge.f32.partialorder %v426_v53, 0.0  ;;  %v432_v56 = vmul.f32 0.01, %v426_v53  ;;  %1212 = vmatpush1.bf16.msra.mxu0 %v1211_v47 }
 0x167   : > { %v434_v57 = vsel %vm430_vm5, %v426_v53, %v432_v56  ;;  %v1215_v53 = vpack.c.bf16 %v781_v50, %v779_v49  ;;  %v785_v56 = vld [vmem:[%s1674_s6 + $0xb0] sm:$0xff] }
 0x168   : > { %v438_v61 = vrot.slane %v434_v57, 1  ;;  %v443_v63 = vrot.slane %v434_v57, 2 }
 0x16a   : > { %v439_v0 = vsel %vm298_vm1, %v437_v60, %v438_v61  ;;  %v444_v3 = vsel %vm310_vm2, %v442_v62, %v443_v63  ;;  %v789_v62 = vld [vmem:[%s1674_s6 + $0xd0] sm:$0xff] }
 0x16b   : > { %566 = vmatprep.mubr.f32.mxu1 %v439_v0 }
 0x16c   : > { %567 = vmatmul.mubr.f32.vlgmr.msra.gmra.mrb[0].mxu1 %v433_v55  ;;  %v783_v55 = vld [vmem:[%s1674_s6 + $0xa0] sm:$0xff] }
 0x16d   : > { %1162 = vmatpush3.bf16.msra.mxu1 %v1159_v46  ;;  %571 = vmatprep.mubr.f32.mxu1 %v438_v61  ;;  %v782_v46 = vld [vmem:[%s1674_s6 + $0x98] sm:$0xff]  ;;  %v1219_v59 = vpack.c.bf16 %v785_v56, %v783_v55  ;;  %v787_v61 = vld [vmem:[%s1674_s6 + $0xc0] sm:$0xff] }
 0x16e   : > { %1164 = vmatprep.subr.bf16.mxu1 %v1163_v2  ;;  %v1213_v48 = vpack.c.bf16 %v782_v46, %v780_v45 }
 0x170   : > { %572 = vmatmul.mubr.f32.gmra.mrb[2].mxu1 %v434_v57  ;;  %1214 = vmatprep.subr.bf16.mxu0 %v1213_v48  ;;  %v788_v57 = vld [vmem:[%s1674_s6 + $0xc8] sm:$0xff] }
 0x171   : > { %1166 = vmatpush3.bf16.msra.mxu1 %v1163_v2  ;;  %1078 = vmatprep.mubr.f32.mxu1 %v444_v3  ;;  %v1221_v60 = vpack.c.bf16 %v790_v58, %v788_v57 }
 0x172   : > { %1168 = vmatprep.subr.bf16.mxu1 %v1167_v6  ;;  %1216 = vmatpush1.bf16.msra.mxu0 %v1215_v53 }
 0x173   : > { %1218 = vmatprep.subr.bf16.mxu0 %v1217_v54 }
 0x175   : > { %1170 = vmatpush3.bf16.msra.mxu1 %v1167_v6 }
 0x176   : > { %1172 = vmatprep.subr.bf16.mxu1 %v1171_v9  ;;  %1220 = vmatpush1.bf16.msra.mxu0 %v1219_v59 }
 0x177   : > { %1222 = vmatprep.subr.bf16.mxu0 %v1221_v60 }
 0x179   : > { %1174 = vmatpush3.bf16.msra.mxu1 %v1171_v9 }
 0x17a   : > { %1176 = vmatprep.subr.bf16.mxu1 %v1175_v12 }
 0x17d   : > { %1178 = vmatpush3.bf16.msra.mxu1 %v1175_v12 }
 0x17e   : > { %1180 = vmatprep.subr.bf16.mxu1 %v1179_v15 }
 0x181   : > { %1182 = vmatpush3.bf16.msra.mxu1 %v1179_v15 }
 0x182   : > { %1184 = vmatprep.subr.bf16.mxu1 %v1183_v20 }
 0x185   : > { %1186 = vmatpush3.bf16.msra.mxu1 %v1183_v20 }
 0x186   : > { %1188 = vmatprep.subr.bf16.mxu1 %v1187_v23 }
 0x189   : > { %1190 = vmatpush3.bf16.msra.mxu1 %v1187_v23  ;;  %v661_v23 = vld [vmem:[%s1673_s5 + $0x18] sm:$0xf] }
 0x18c   : > { %1079 = vmatmul.mubr.f32.vlgmr.msra.gmra.mrb[4].mxu1 %v443_v63  ;;  %v1223_v63 = vpack.c.bf16 %v789_v62, %v787_v61 }
 0x18d   : > { %1085 = vmatprep.mubr.msk.f32.mxu1 %vm662_vm6, %v658_v24  ;;  %v1248_v24 = vmov 0.0  }
 0x18e   : > { %1224 = vmatpush1.bf16.msra.mxu0 %v1223_v63  ;;  %868 = vmatprep.mubr.f32.mxu0 %v1248_v24 }
 0x23f   : > { %v1016_v0 = vpop.f32.mrb[0].mxu1 }
 0x240   : > { %v1017_v2 = vpop.f32.mrb[1].mxu1 }
 0x241   : > { %v1018_v3 = vadd.f32 %v1017_v2, %v1016_v0 }
 0x243   : > { %v1019_v4 = vpop.f32.mrb[2].mxu1  ;;  %v569_v10 = vadd.f32 %v1018_v3, %v970_v7 }
 0x244   : > { %v1020_v5 = vpop.f32.mrb[3].mxu1 }
 0x245   : > { %v1021_v6 = vadd.f32 %v1020_v5, %v1019_v4 }
 0x247   : > { %v574_v8 = vadd.f32 %v1021_v6, %v970_v7 }
 0x25f   : > { %v1080_v9 = vpop.f32.mrb[4].mxu1 }
 0x260   : > { %v649_v11 = vadd.f32 %v1080_v9, %v574_v8  ;;  %v643_v12 = vpop.f32.mrb[5].mxu1 }
 0x261   : > { %v644_v13 = vadd.f32 %v643_v12, %v569_v10 }
 0x262   : > { %vm653_vm7 = vcmp.ge.f32.partialorder %v649_v11, 0.0  ;;  %v655_v14 = vmul.f32 0.01, %v649_v11 }
 0x263   : > { %vm652_vm8 = vcmp.ge.f32.partialorder %v644_v13, 0.0  ;;  %v654_v15 = vmul.f32 0.01, %v644_v13 }
 0x264   : > { %v657_v18 = vsel %vm653_vm7, %v649_v11, %v655_v14 }
 0x265   : > { %v656_v19 = vsel %vm652_vm8, %v644_v13, %v654_v15 }
 0x266   : > { %v1191_v20 = vpack.c.bf16 %v657_v18, %v656_v19 }
 0x268   : > { %1193 = vmatprep.subr.msk.bf16.mxu1 %vm1192_vm10, %v1191_v20 }
 0x269   : > { %1196 = vmatpush3.bf16.msk.msra.mxu1 %vm1192_vm10, %v1191_v20 }
 0x26c   : > { %1086 = vmatmul.mubr.msk.f32.vlgmr.msra.gmra.mrb[6].mxu1 %vm662_vm6, %v659_v21 }
 0x26d   : > { %1088 = vmatprep.mubr.msk.f32.mxu1 %vm662_vm6, %v660_v22 }
 0x270   : > { %1089 = vmatmul.mubr.msk.f32.gmra.mrb[8].mxu1 %vm662_vm6, %v661_v23 }
 0x33f   : > { %v1087_v25 = vpop.f32.mrb[6].mxu1 }
 0x340   : > { %v744_v26 = vpop.f32.mrb[7].mxu1 }
 0x341   : > { %976 = vmatmul.mubr.msk.f32.vlgmr.msra.gmra.mrb[4].mxu0 %vm791_vm11, %v744_v26 }
 0x342   : > { %874 = vmatprep.mubr.f32.mxu0 %v1248_v24 }
 0x343   : > { %v1090_v27 = vpop.f32.mrb[8].mxu1 }
 0x344   : > { %v754_v28 = vpop.f32.mrb[9].mxu1 }
 0x345   : > { %977 = vmatmul.mubr.msk.f32.gmra.mrb[6].mxu0 %vm791_vm11, %v1087_v25 }
 0x346   : > { %880 = vmatprep.mubr.f32.mxu0 %v1248_v24 }
 0x349   : > { %978 = vmatmul.mubr.msk.f32.gmra.mrb[8].mxu0 %vm791_vm11, %v754_v28 }
 0x34a   : > { %886 = vmatprep.mubr.f32.mxu0 %v1248_v24 }
 0x34d   : > { %979 = vmatmul.mubr.msk.f32.gmra.mrb[10].mxu0 %vm791_vm11, %v1090_v27 }
 0x414   : > { %v870_v29 = vpop.f32.mrb[4].mxu0 }
 0x415   : > { %893 = vst [vmem:[%s278_s13] sm:$0xff] %v870_v29  ;;  %v872_v1 = vpop.f32.mrb[5].mxu0 }
 0x416   : > { %895 = vst.msk [vmem:[%s278_s13 + $0x8] sm:$0xff] %vm894_vm12, %v872_v1 }
 0x418   : > { %v876_v30 = vpop.f32.mrb[6].mxu0 }
 0x419   : > { %896 = vst [vmem:[%s278_s13 + $0x10] sm:$0xff] %v876_v30  ;;  %v878_v17 = vpop.f32.mrb[7].mxu0 }
 0x41a   : > { %897 = vst.msk [vmem:[%s278_s13 + $0x18] sm:$0xff] %vm894_vm12, %v878_v17 }
 0x41c   : > { %v882_v31 = vpop.f32.mrb[8].mxu0 }
 0x41d   : > { %898 = vst [vmem:[%s278_s13 + $0x20] sm:$0xff] %v882_v31  ;;  %v884_v32 = vpop.f32.mrb[9].mxu0 }
 0x41e   : > { %899 = vst.msk [vmem:[%s278_s13 + $0x28] sm:$0xff] %vm894_vm12, %v884_v32 }
 0x420   : > { %v888_v16 = vpop.f32.mrb[10].mxu0 }
 0x421   : > { %900 = vst [vmem:[%s278_s13 + $0x30] sm:$0xf] %v888_v16  ;;  %v890_v33 = vpop.f32.mrb[11].mxu0 }
 0x422   : > { %902 = vst.msk [vmem:[%s278_s13 + $0x38] sm:$0xf] %vm901_vm13, %v890_v33 }
 0x423 PF: > { %s17_s24 = sadd.s32 1, %s1243_s24  }
 0x424   : > { %p14_p4 = scmp.ge.s32.totalorder %s17_s24, 4  }
 0x426   :  { %16 = sbr.rel (!%p14_p4) target bundleno = 1 (0x1), region = 78 }

</bundles_post_ra>
